<compile_context>
chip_gen: v5e
topology: v5e:2x2
jax: 0.10.0
libtpu: 0.0.40
codegen_flags: <defaults>
</compile_context>

<pallas_src>
import functools

import numpy as np
import jax
import jax.numpy as jnp
from jax.experimental import pallas as pl
from jax.experimental.pallas import tpu as pltpu


def _round_up(x, m):
    return (x + m - 1) // m * m


def deconv2d_batchnorm_relu(x, weight, bias, gamma, beta, *, stride, padding,
                            eps=1e-5, tm_max=4096, mxu_dtype=jnp.bfloat16):
    """Forward pass of deconv2DBatchNormRelu.

    x:      (N, C_in, H, W)      float32, NCHW
    weight: (C_in, C_out, k, k)  float32  (nn.ConvTranspose2d weight layout)
    bias:   (C_out,)
    gamma, beta: (C_out,)        BatchNorm2d affine params
    returns (N, C_out, H_out, W_out), H_out = (H-1)*stride - 2*pad + k
    """
    N, C_in, H, W = x.shape
    C_in_w, C_out, kH, kW = weight.shape
    assert C_in == C_in_w and kH == kW
    k, s, p = kH, stride, padding
    H_out = (H - 1) * s - 2 * p + k
    W_out = (W - 1) * s - 2 * p + k
    assert H_out >= 1 and W_out >= 1
    M_true = N * H_out * W_out                      # true BN element count

    # ---------- static sub-pixel (stride-phase) decomposition -------------
    # y[n,co,ho,wo] = sum_{ci,kh,kw} x[n,ci,hi,wi] w[ci,co,kh,kw],
    #   hi = (ho + p - kh)/s when divisible.  With ho = s*oh + phase, the
    #   valid kh form an arithmetic set and hi = oh + (static offset).
    k_sub = -(-k // s)                              # taps per dim per phase
    K_sub = k_sub * k_sub * C_in
    oh_grid = -(-H_out // s)                        # uniform per-phase grid
    ow_grid = -(-W_out // s)
    M_phase = N * oh_grid * ow_grid
    n_phases = s * s

    phase_taps = []                                 # (kh list, input offset list)
    for ph in range(s):
        r = (ph + p) % s
        taps = list(range(r, k, s))
        base = (ph + p) // s
        offs = [base - j for j in range(len(taps))]
        phase_taps.append((taps, offs))

    all_offs = [o for _, offs in phase_taps for o in offs] or [0]
    pad_lo = max(0, -min(all_offs))
    pad_hi_h = max(0, (oh_grid - 1) + max(all_offs) - (H - 1))
    pad_hi_w = max(0, (ow_grid - 1) + max(all_offs) - (W - 1))

    # lane tiling of the per-phase M axis (tm is always a multiple of 128)
    tm = min(tm_max, _round_up(M_phase, 128))
    n_tiles = -(-M_phase // tm)
    M_p = n_tiles * tm

    # ---------- glue: bf16 patches + per-phase sub-kernels ----------------
    x_b = x.astype(mxu_dtype)                       # cast BEFORE building patches
    x_pad = jnp.pad(x_b, ((0, 0), (0, 0),
                          (pad_lo, pad_hi_h), (pad_lo, pad_hi_w)))
    w_f = weight.astype(jnp.float32)

    patch_blocks, w_blocks = [], []
    for ph in range(s):
        taps_h, offs_h = phase_taps[ph]
        for pw in range(s):
            taps_w, offs_w = phase_taps[pw]
            rows, wrows = [], []
            for jh in range(k_sub):
                for jw in range(k_sub):
                    if jh < len(taps_h) and jw < len(taps_w):
                        a = pad_lo + offs_h[jh]
                        b = pad_lo + offs_w[jw]
                        rows.append(x_pad[:, :, a:a + oh_grid, b:b + ow_grid])
                        wrows.append(w_f[:, :, taps_h[jh], taps_w[jw]])
                    else:                            # padded (zero) tap
                        rows.append(jnp.zeros((N, C_in, oh_grid, ow_grid), mxu_dtype))
                        wrows.append(jnp.zeros((C_in, C_out), jnp.float32))
            blk = jnp.stack(rows, axis=0)            # (k_sub^2, N, C_in, oh, ow)
            blk = jnp.transpose(blk, (0, 2, 1, 3, 4))  # leading-axis swap only
            blk = blk.reshape(K_sub, M_phase)        # rows (jh,jw,ci), cols (n,oh,ow)
            # zero columns whose output position falls past H_out/W_out so they
            # contribute exactly 0 to the BN statistics (static numpy mask).
            vh = (s * np.arange(oh_grid) + ph) < H_out
            vw = (s * np.arange(ow_grid) + pw) < W_out
            col_ok = (np.ones((N, 1, 1), np.float32)
                      * vh[None, :, None] * vw[None, None, :]).reshape(1, M_phase)
            blk = blk * jnp.asarray(col_ok, mxu_dtype)
            patch_blocks.append(blk)

            wblk = jnp.stack(wrows, axis=0)          # (k_sub^2, C_in, C_out)
            wblk = jnp.transpose(wblk, (2, 0, 1)).reshape(C_out, K_sub)
            w_blocks.append(wblk)

    patches = jnp.stack(patch_blocks, axis=0)        # (n_phases, K_sub, M_phase)
    patches = jnp.pad(patches, ((0, 0), (0, 0), (0, M_p - M_phase)))
    w_all = jnp.stack(w_blocks, axis=0).astype(mxu_dtype)   # (n_phases, C_out, K_sub)

    # ---------- kernel 1: per-phase conv matmul + per-channel stats -------
    def conv_stats_kernel(w_ref, p_ref, y_ref, s1_ref, s2_ref):
        y = jnp.dot(w_ref[...], p_ref[...],
                    preferred_element_type=jnp.float32)       # (C_out, tm) f32
        y_ref[...] = y.astype(y_ref.dtype)                    # bf16 intermediate

        step = pl.program_id(0) * pl.num_programs(1) + pl.program_id(1)

        @pl.when(step == 0)
        def _():
            s1_ref[...] = jnp.zeros_like(s1_ref)
            s2_ref[...] = jnp.zeros_like(s2_ref)

        # no masking needed: padded / out-of-range columns are exactly zero
        s1_ref[...] += jnp.sum(y, axis=1, keepdims=True)
        s2_ref[...] += jnp.sum(y * y, axis=1, keepdims=True)

    flops1 = 2 * n_phases * M_p * K_sub * C_out
    bytes1 = (n_phases * K_sub * M_p + n_phases * C_out * K_sub
              + n_phases * C_out * M_p) * 2 + 2 * C_out * 4
    # raise the scoped-VMEM limit only if the double-buffered blocks get big
    vmem_est = 2 * (K_sub * tm + C_out * tm + C_out * K_sub) * 2 + (1 << 20)
    vmem_limit = max(2 * vmem_est, 32 << 20) if vmem_est > (12 << 20) else None

    y_bf16, ch_sum, ch_sumsq = pl.pallas_call(
        conv_stats_kernel,
        out_shape=(
            jax.ShapeDtypeStruct((n_phases, C_out, M_p), mxu_dtype),
            jax.ShapeDtypeStruct((C_out, 1), jnp.float32),
            jax.ShapeDtypeStruct((C_out, 1), jnp.float32),
        ),
        grid=(n_phases, n_tiles),
        in_specs=[
            pl.BlockSpec((None, C_out, K_sub), lambda c, i: (c, 0, 0)),
            pl.BlockSpec((None, K_sub, tm), lambda c, i: (c, 0, i)),
        ],
        out_specs=(
            pl.BlockSpec((None, C_out, tm), lambda c, i: (c, 0, i)),
            pl.BlockSpec((C_out, 1), lambda c, i: (0, 0)),     # resident sum
            pl.BlockSpec((C_out, 1), lambda c, i: (0, 0)),     # resident sumsq
        ),
        compiler_params=pltpu.CompilerParams(
            dimension_semantics=("arbitrary", "arbitrary"),
            vmem_limit_bytes=vmem_limit),
        cost_estimate=pl.CostEstimate(flops=flops1, transcendentals=0,
                                      bytes_accessed=bytes1),
    )(w_all, patches)

    # ---------- glue: fold batch stats (and conv bias) into scale/shift ----
    mean = ch_sum / M_true                              # mean of conv output w/o bias
    var = jnp.maximum(ch_sumsq / M_true - mean * mean, 0.0)
    scale = gamma.reshape(C_out, 1).astype(jnp.float32) * jax.lax.rsqrt(var + eps)
    shift = beta.reshape(C_out, 1).astype(jnp.float32) - mean * scale
    del bias  # cancels exactly under training-mode BatchNorm

    # ---------- kernel 2: fused BatchNorm affine + ReLU (lane-dense) -------
    def bn_relu_kernel(y_ref, sc_ref, sh_ref, o_ref):
        y = y_ref[...].astype(jnp.float32)              # f32 elementwise (v5e-safe)
        o_ref[...] = jnp.maximum(y * sc_ref[...] + sh_ref[...], 0.0)

    flops2 = 3 * n_phases * C_out * M_p
    bytes2 = n_phases * C_out * M_p * (2 + 4) + 2 * C_out * 4

    out_pm = pl.pallas_call(
        bn_relu_kernel,
        out_shape=jax.ShapeDtypeStruct((n_phases, C_out, M_p), jnp.float32),
        grid=(n_phases, n_tiles),
        in_specs=[
            pl.BlockSpec((None, C_out, tm), lambda c, i: (c, 0, i)),
            pl.BlockSpec((C_out, 1), lambda c, i: (0, 0)),
            pl.BlockSpec((C_out, 1), lambda c, i: (0, 0)),
        ],
        out_specs=pl.BlockSpec((None, C_out, tm), lambda c, i: (c, 0, i)),
        compiler_params=pltpu.CompilerParams(
            dimension_semantics=("parallel", "parallel")),
        cost_estimate=pl.CostEstimate(flops=flops2, transcendentals=0,
                                      bytes_accessed=bytes2),
    )(y_bf16, scale, shift)

    # ---------- phase de-interleave -> NCHW --------------------------------
    y = out_pm[:, :, :M_phase].reshape(s, s, C_out, N, oh_grid, ow_grid)
    y = jnp.transpose(y, (3, 2, 4, 0, 5, 1))            # (N, C_out, oh, s, ow, s)
    y = y.reshape(N, C_out, oh_grid * s, ow_grid * s)
    return y[:, :, :H_out, :W_out]


def reference(x, weight, bias, gamma, beta, stride, padding, eps=1e-5):
    """Pure-JAX reference of ConvTranspose2d + BatchNorm2d(train) + ReLU."""
    C_in, C_out, k, _ = weight.shape
    q = k - 1 - padding
    w_t = jnp.transpose(weight[:, :, ::-1, ::-1], (1, 0, 2, 3))   # OIHW
    dn = jax.lax.conv_dimension_numbers(x.shape, w_t.shape, ('NCHW', 'OIHW', 'NCHW'))
    y = jax.lax.conv_general_dilated(
        x, w_t, window_strides=(1, 1), padding=((q, q), (q, q)),
        lhs_dilation=(stride, stride), dimension_numbers=dn)
    y = y + bias.reshape(1, -1, 1, 1)
    mean = y.mean(axis=(0, 2, 3), keepdims=True)
    var = y.var(axis=(0, 2, 3), keepdims=True)
    yn = (y - mean) * jax.lax.rsqrt(var + eps)
    yn = yn * gamma.reshape(1, -1, 1, 1) + beta.reshape(1, -1, 1, 1)
    return jnp.maximum(yn, 0.0)


if __name__ == "__main__":
    # module config: deconv2DBatchNormRelu(in_channels=4, n_filters=4,
    #                                      k_size=3, stride=2, padding=1, bias=True)
    N, C_in, H, W = 2, 4, 16, 16
    C_out, k, stride, padding = 4, 3, 2, 1

    key = jax.random.PRNGKey(0)
    k1, k2, k3, k4, k5 = jax.random.split(key, 5)
    x = jax.random.normal(k1, (N, C_in, H, W), jnp.float32)
    weight = jax.random.normal(k2, (C_in, C_out, k, k), jnp.float32) * 0.1
    bias = jax.random.normal(k3, (C_out,), jnp.float32) * 0.1
    gamma = 1.0 + 0.1 * jax.random.normal(k4, (C_out,), jnp.float32)
    beta = 0.1 * jax.random.normal(k5, (C_out,), jnp.float32)

    fwd = jax.jit(functools.partial(deconv2d_batchnorm_relu,
                                    stride=stride, padding=padding))
    out = fwd(x, weight, bias, gamma, beta)
    out = jax.block_until_ready(out)

    ref = reference(x, weight, bias, gamma, beta, stride, padding)
    H_out = (H - 1) * stride - 2 * padding + k
    assert out.shape == ref.shape == (N, C_out, H_out, H_out)
    max_err = float(jnp.max(jnp.abs(out - ref)))
    # bf16 MXU inputs with f32 accumulation: tolerance covers input quantization
    # (outputs are O(1) after BatchNorm, so 3e-2 abs ~ a few percent relative).
    if max_err > 3e-2:
        raise SystemExit(f"mismatch vs reference: max abs err = {max_err}")
    print("KERNEL_OK")
</pallas_src>

<mosaic_0001>
module attributes {stable_mosaic.version = 11 : i64} {
  func.func @conv_stats_kernel(%arg0: i32, %arg1: i32, %arg2: memref<1x4x16xbf16, #tpu.memory_space<vmem>>, %arg3: memref<1x16x512xbf16, #tpu.memory_space<vmem>>, %arg4: memref<1x4x512xbf16, #tpu.memory_space<vmem>>, %arg5: memref<4x1xf32, #tpu.memory_space<vmem>>, %arg6: memref<4x1xf32, #tpu.memory_space<vmem>>) attributes {dimension_semantics = [#tpu.dimension_semantics<arbitrary>, #tpu.dimension_semantics<arbitrary>], iteration_bounds = array<i64: 4, 1>, scalar_prefetch = 0 : i64, scratch_operands = 0 : i64, tpu.core_type = #tpu.core_type<tc>, window_params = [{transform_indices = @transform_0, window_bounds = array<i64: 1, 4, 16>}, {transform_indices = @transform_1, window_bounds = array<i64: 1, 16, 512>}, {transform_indices = @transform_2, window_bounds = array<i64: 1, 4, 512>}, {pipeline_mode = #tpu.pipeline_mode<synchronous>, transform_indices = @transform_3, window_bounds = array<i64: 4, 1>}, {pipeline_mode = #tpu.pipeline_mode<synchronous>, transform_indices = @transform_4, window_bounds = array<i64: 4, 1>}]} {
    %c0 = arith.constant 0 : index
    %c0_0 = arith.constant 0 : index
    %c0_1 = arith.constant 0 : index
    %0 = vector.load %arg2[%c0, %c0_0, %c0_1] : memref<1x4x16xbf16, #tpu.memory_space<vmem>>, vector<1x4x16xbf16>
    %1 = vector.shape_cast %0 : vector<1x4x16xbf16> to vector<4x16xbf16>
    %c0_2 = arith.constant 0 : index
    %c0_3 = arith.constant 0 : index
    %c0_4 = arith.constant 0 : index
    %2 = vector.load %arg3[%c0_2, %c0_3, %c0_4] : memref<1x16x512xbf16, #tpu.memory_space<vmem>>, vector<1x16x512xbf16>
    %3 = vector.shape_cast %2 : vector<1x16x512xbf16> to vector<16x512xbf16>
    %cst = arith.constant dense<0.000000e+00> : vector<4x512xf32>
    %4 = tpu.matmul %1, %3, %cst {dimension_numbers = #tpu.dot_dimension_numbers<[1], [0], [0], [1], [0, 0, 1, 1], [], []>} : vector<4x16xbf16>, vector<16x512xbf16>, vector<4x512xf32> -> vector<4x512xf32>
    %5 = arith.truncf %4 : vector<4x512xf32> to vector<4x512xbf16>
    %c0_5 = arith.constant 0 : index
    %c0_6 = arith.constant 0 : index
    %c0_7 = arith.constant 0 : index
    %6 = vector.load %arg4[%c0_5, %c0_6, %c0_7] : memref<1x4x512xbf16, #tpu.memory_space<vmem>>, vector<1x4x512xbf16>
    %7 = vector.shape_cast %6 : vector<1x4x512xbf16> to vector<4x512xbf16>
    %8 = vector.shape_cast %5 : vector<4x512xbf16> to vector<1x4x512xbf16>
    tpu.vector_store %arg4[%c0_5, %c0_6, %c0_7], %8 {strides = array<i32>} : memref<1x4x512xbf16, #tpu.memory_space<vmem>>, vector<1x4x512xbf16>,
    %c1_i32 = arith.constant 1 : i32
    %9 = arith.muli %arg0, %c1_i32 : i32
    %10 = arith.addi %9, %arg1 : i32
    %c0_i32 = arith.constant 0 : i32
    %11 = arith.cmpi eq, %10, %c0_i32 : i32
    %12 = arith.extui %11 : i1 to i32
    %c0_i32_8 = arith.constant 0 : i32
    %13 = arith.cmpi ne, %12, %c0_i32_8 : i32
    scf.if %13 {
      %cst_19 = arith.constant 0.000000e+00 : f32
      %25 = vector.broadcast %cst_19 : f32 to vector<4x1xf32>
      %c0_20 = arith.constant 0 : index
      %c0_21 = arith.constant 0 : index
      %26 = vector.load %arg5[%c0_20, %c0_21] : memref<4x1xf32, #tpu.memory_space<vmem>>, vector<4x1xf32>
      tpu.vector_store %arg5[%c0_20, %c0_21], %25 {strides = array<i32>} : memref<4x1xf32, #tpu.memory_space<vmem>>, vector<4x1xf32>,
      %cst_22 = arith.constant 0.000000e+00 : f32
      %27 = vector.broadcast %cst_22 : f32 to vector<4x1xf32>
      %c0_23 = arith.constant 0 : index
      %c0_24 = arith.constant 0 : index
      %28 = vector.load %arg6[%c0_23, %c0_24] : memref<4x1xf32, #tpu.memory_space<vmem>>, vector<4x1xf32>
      tpu.vector_store %arg6[%c0_23, %c0_24], %27 {strides = array<i32>} : memref<4x1xf32, #tpu.memory_space<vmem>>, vector<4x1xf32>,
    } else {
    }
    %c0_9 = arith.constant 0 : index
    %c0_10 = arith.constant 0 : index
    %14 = vector.load %arg5[%c0_9, %c0_10] : memref<4x1xf32, #tpu.memory_space<vmem>>, vector<4x1xf32>
    %cst_11 = arith.constant dense<0.000000e+00> : vector<4xf32>
    %15 = vector.multi_reduction <add>, %4, %cst_11 [1] : vector<4x512xf32> to vector<4xf32>
    %16 = vector.shape_cast %15 : vector<4xf32> to vector<4x1xf32>
    %17 = arith.addf %14, %16 : vector<4x1xf32>
    %c0_12 = arith.constant 0 : index
    %c0_13 = arith.constant 0 : index
    %18 = vector.load %arg5[%c0_12, %c0_13] : memref<4x1xf32, #tpu.memory_space<vmem>>, vector<4x1xf32>
    tpu.vector_store %arg5[%c0_12, %c0_13], %17 {strides = array<i32>} : memref<4x1xf32, #tpu.memory_space<vmem>>, vector<4x1xf32>,
    %c0_14 = arith.constant 0 : index
    %c0_15 = arith.constant 0 : index
    %19 = vector.load %arg6[%c0_14, %c0_15] : memref<4x1xf32, #tpu.memory_space<vmem>>, vector<4x1xf32>
    %20 = arith.mulf %4, %4 : vector<4x512xf32>
    %cst_16 = arith.constant dense<0.000000e+00> : vector<4xf32>
    %21 = vector.multi_reduction <add>, %20, %cst_16 [1] : vector<4x512xf32> to vector<4xf32>
    %22 = vector.shape_cast %21 : vector<4xf32> to vector<4x1xf32>
    %23 = arith.addf %19, %22 : vector<4x1xf32>
    %c0_17 = arith.constant 0 : index
    %c0_18 = arith.constant 0 : index
    %24 = vector.load %arg6[%c0_17, %c0_18] : memref<4x1xf32, #tpu.memory_space<vmem>>, vector<4x1xf32>
    tpu.vector_store %arg6[%c0_17, %c0_18], %23 {strides = array<i32>} : memref<4x1xf32, #tpu.memory_space<vmem>>, vector<4x1xf32>,
    return
  }
  func.func @transform_0(%arg0: i32, %arg1: i32) -> (i32, i32, i32) {
    %c0_i32 = arith.constant 0 : i32
    %c0_i32_0 = arith.constant 0 : i32
    %c0_i32_1 = arith.constant 0 : i32
    return %arg0, %c0_i32, %c0_i32_0 : i32, i32, i32
  }
  func.func @transform_1(%arg0: i32, %arg1: i32) -> (i32, i32, i32) {
    %c0_i32 = arith.constant 0 : i32
    %c0_i32_0 = arith.constant 0 : i32
    return %arg0, %c0_i32, %arg1 : i32, i32, i32
  }
  func.func @transform_2(%arg0: i32, %arg1: i32) -> (i32, i32, i32) {
    %c0_i32 = arith.constant 0 : i32
    %c0_i32_0 = arith.constant 0 : i32
    return %arg0, %c0_i32, %arg1 : i32, i32, i32
  }
  func.func @transform_3(%arg0: i32, %arg1: i32) -> (i32, i32) {
    %c0_i32 = arith.constant 0 : i32
    %c0_i32_0 = arith.constant 0 : i32
    %c0_i32_1 = arith.constant 0 : i32
    return %c0_i32, %c0_i32_0 : i32, i32
  }
  func.func @transform_4(%arg0: i32, %arg1: i32) -> (i32, i32) {
    %c0_i32 = arith.constant 0 : i32
    %c0_i32_0 = arith.constant 0 : i32
    %c0_i32_1 = arith.constant 0 : i32
    return %c0_i32, %c0_i32_0 : i32, i32
  }
}

module attributes {stable_mosaic.version = 11 : i64} {
  func.func @bn_relu_kernel(%arg0: i32, %arg1: i32, %arg2: memref<1x4x512xbf16, #tpu.memory_space<vmem>>, %arg3: memref<4x1xf32, #tpu.memory_space<vmem>>, %arg4: memref<4x1xf32, #tpu.memory_space<vmem>>, %arg5: memref<1x4x512xf32, #tpu.memory_space<vmem>>) attributes {dimension_semantics = [#tpu.dimension_semantics<parallel>, #tpu.dimension_semantics<parallel>], iteration_bounds = array<i64: 4, 1>, scalar_prefetch = 0 : i64, scratch_operands = 0 : i64, tpu.core_type = #tpu.core_type<tc>, window_params = [{transform_indices = @transform_0, window_bounds = array<i64: 1, 4, 512>}, {pipeline_mode = #tpu.pipeline_mode<synchronous>, transform_indices = @transform_1, window_bounds = array<i64: 4, 1>}, {pipeline_mode = #tpu.pipeline_mode<synchronous>, transform_indices = @transform_2, window_bounds = array<i64: 4, 1>}, {transform_indices = @transform_3, window_bounds = array<i64: 1, 4, 512>}]} {
    %c0 = arith.constant 0 : index
    %c0_0 = arith.constant 0 : index
    %c0_1 = arith.constant 0 : index
    %0 = vector.load %arg2[%c0, %c0_0, %c0_1] : memref<1x4x512xbf16, #tpu.memory_space<vmem>>, vector<1x4x512xbf16>
    %1 = vector.shape_cast %0 : vector<1x4x512xbf16> to vector<4x512xbf16>
    %2 = arith.extf %1 : vector<4x512xbf16> to vector<4x512xf32>
    %c0_2 = arith.constant 0 : index
    %c0_3 = arith.constant 0 : index
    %3 = vector.load %arg3[%c0_2, %c0_3] : memref<4x1xf32, #tpu.memory_space<vmem>>, vector<4x1xf32>
    %4 = vector.broadcast %3 : vector<4x1xf32> to vector<4x512xf32>
    %5 = arith.mulf %2, %4 : vector<4x512xf32>
    %c0_4 = arith.constant 0 : index
    %c0_5 = arith.constant 0 : index
    %6 = vector.load %arg4[%c0_4, %c0_5] : memref<4x1xf32, #tpu.memory_space<vmem>>, vector<4x1xf32>
    %7 = vector.broadcast %6 : vector<4x1xf32> to vector<4x512xf32>
    %8 = arith.addf %5, %7 : vector<4x512xf32>
    %cst = arith.constant 0.000000e+00 : f32
    %9 = vector.broadcast %cst : f32 to vector<4x512xf32>
    %10 = arith.maximumf %8, %9 : vector<4x512xf32>
    %c0_6 = arith.constant 0 : index
    %c0_7 = arith.constant 0 : index
    %c0_8 = arith.constant 0 : index
    %11 = vector.load %arg5[%c0_6, %c0_7, %c0_8] : memref<1x4x512xf32, #tpu.memory_space<vmem>>, vector<1x4x512xf32>
    %12 = vector.shape_cast %11 : vector<1x4x512xf32> to vector<4x512xf32>
    %13 = vector.shape_cast %10 : vector<4x512xf32> to vector<1x4x512xf32>
    tpu.vector_store %arg5[%c0_6, %c0_7, %c0_8], %13 {strides = array<i32>} : memref<1x4x512xf32, #tpu.memory_space<vmem>>, vector<1x4x512xf32>,
    return
  }
  func.func @transform_0(%arg0: i32, %arg1: i32) -> (i32, i32, i32) {
    %c0_i32 = arith.constant 0 : i32
    %c0_i32_0 = arith.constant 0 : i32
    return %arg0, %c0_i32, %arg1 : i32, i32, i32
  }
  func.func @transform_1(%arg0: i32, %arg1: i32) -> (i32, i32) {
    %c0_i32 = arith.constant 0 : i32
    %c0_i32_0 = arith.constant 0 : i32
    %c0_i32_1 = arith.constant 0 : i32
    return %c0_i32, %c0_i32_0 : i32, i32
  }
  func.func @transform_2(%arg0: i32, %arg1: i32) -> (i32, i32) {
    %c0_i32 = arith.constant 0 : i32
    %c0_i32_0 = arith.constant 0 : i32
    %c0_i32_1 = arith.constant 0 : i32
    return %c0_i32, %c0_i32_0 : i32, i32
  }
  func.func @transform_3(%arg0: i32, %arg1: i32) -> (i32, i32, i32) {
    %c0_i32 = arith.constant 0 : i32
    %c0_i32_0 = arith.constant 0 : i32
    return %arg0, %c0_i32, %arg1 : i32, i32, i32
  }
}

</mosaic_0001>

<bundles_post_ra>
// kernel: deconv2d_batchnorm_relu.3
= control target key start
LH: loop header
LB: loop body
LE: loop exit
PB: predicated region body
PF: predicated region fallthrough
CT: control target
= control target key end

     0   :  { %s414_s12 = smov 0   ;;  %s416_s13 = smov 0   ;;  %s453_s0 = inlined_call_operand.vmem [shape: bf16[4,4,512], index: 0, kind: input, shape index: {}]   ;;  %s454_s1 = inlined_call_operand.vmem [shape: f32[4,1], index: 1, kind: input, shape index: {}]   ;;  %s455_s2 = inlined_call_operand.vmem [shape: f32[4,1], index: 2, kind: input, shape index: {}]   ;;  %s456_s3 = inlined_call_operand.vmem [shape: f32[4,4,512], index: 3, kind: output, shape index: {}]  }
   0x1   :  { %s418_s14 = smov 0  }
   0x2 LB: > { %s25_s15 = sadd.s32 1, %s386_s13  ;;  %p332_p0 = scmp.ge.s32.totalorder %s390_s14, 1  ;;  %s390_s14 = sphi %s418_s14, %s13_s14   ;;  %s386_s13 = sphi %s416_s13, %s458_s13   ;;  %s382_s12 = sphi %s414_s12, %s457_s12  }
   0x3   : > { %p27_p1 = scmp.ge.s32.totalorder %s25_s15, 4  ;;  %p158_p2 = scmp.lt.s32.totalorder %s390_s14, 5 }
   0x5   : > { %s460_s15 = smov (%p27_p1, %s25_s15), 0  ;;  %p159_p3 = pnand %p332_p0, %p158_p2 }
   0x6   : > { %p191_p4 = scmp.lt.s32.totalorder (!%p159_p3), %s382_s12, 3 }
   0x7   : > { %162 = sbr.rel (%p159_p3) target bundleno = 145 (0x91), region = 32 }
   0xc   : > { %v213_v0 = vld [vmem:[%s454_s1] sm:$0xf]  ;;  %v392_v1 = vmov 0   ;;  %s462_s12 = smov (!%p191_p4, %s382_s12), 3  ;;  %v393_v3 = vmov 839922192  }
   0xd   : > { %367 = vset.pattern.permute.xlu0 %v392_v1  ;;  %v225_v2 = vld [vmem:[%s455_s2] sm:$0xf]  ;;  %s339_s20 = sshll.u32 %s462_s12, 3  ;;  %v219_v4 = vunpack.c.l.s4 %v393_v3  ;;  %s340_s24 = sshll.u32 %s462_s12, 4 }
   0xe   : > { %216 = vperm.xlu0 %367, %v213_v0   ;;  %s198_s23 = scalar_lea.vmem %s453_s0, %s339_s20  ;;  %s208_s27 = scalar_lea.vmem %s456_s3, %s340_s24 }
   0xf   : > { %v220_v6 = vunpack.c.0.s8 %v219_v4  ;;  %v210_v7 = vld [vmem:[%s198_s23] sm:$0xff] }
  0x10   : > { %v211_v8 = vunpack.c.l.bf16 %v210_v7  ;;  %v212_v9 = vunpack.c.h.bf16 %v210_v7 }
  0x16   : > { %228 = vperm.xlu0 %367, %v225_v2  }
  0x80   : > { %v217_v5 = vpop.permute.xlu0 %216 }
  0x81   : > { %v221_v10 = vperm.slane %v217_v5, %v220_v6 }
  0x83   : > { %v223_v12 = vmul.f32 %v221_v10, %v211_v8  ;;  %v224_v13 = vmul.f32 %v221_v10, %v212_v9 }
  0x88   : > { %v229_v11 = vpop.permute.xlu0 %228 }
  0x89   : > { %v233_v14 = vperm.slane %v229_v11, %v220_v6 }
  0x8b   : > { %v235_v15 = vadd.f32 %v233_v14, %v223_v12  ;;  %v236_v16 = vadd.f32 %v233_v14, %v224_v13 }
  0x8d   : > { %v237_v17 = vmax.f32 %v235_v15, 0.0  ;;  %v238_v18 = vmax.f32 %v236_v16, 0.0 }
  0x8f   : > { %239 = vst [vmem:[%s208_s27] sm:$0xff] %v237_v17 }
  0x90   : > { %240 = vst [vmem:[%s208_s27 + $0x8] sm:$0xff] %v238_v18 }
  0x91 PF: > { %s13_s14 = sadd.s32 1, %s390_s14   ;;  %s457_s12 = smov %s386_s13 }
  0x92   : > { %p10_p5 = scmp.ge.s32.totalorder %s13_s14, 6   ;;  %s458_s13 = smov %s460_s15 }
  0x94   :  { %12 = sbr.rel (!%p10_p5) target bundleno = 2 (0x2), region = 62 }

// kernel: deconv2d_batchnorm_relu.2
= control target key start
LH: loop header
LB: loop body
LE: loop exit
PB: predicated region body
PF: predicated region fallthrough
CT: control target
= control target key end

     0   :  { %s612_s15 = smov 0   ;;  %s614_s16 = smov 0   ;;  %s685_s0 = inlined_call_operand.vmem [shape: bf16[4,4,16], index: 0, kind: input, shape index: {}]   ;;  %s686_s1 = inlined_call_operand.vmem [shape: bf16[4,16,512], index: 1, kind: input, shape index: {}]   ;;  %s687_s2 = inlined_call_operand.vmem [shape: bf16[4,4,512], index: 2, kind: output, shape index: {0}]   ;;  %s688_s3 = inlined_call_operand.vmem [shape: f32[4,1], index: 3, kind: output, shape index: {1}]   ;;  %s689_s4 = inlined_call_operand.vmem [shape: f32[4,1], index: 4, kind: output, shape index: {2}]  }
   0x1   :  { %s616_s17 = smov 0  }
   0x2 LB: > { %s27_s18 = sadd.s32 1, %s580_s16  ;;  %p502_p0 = scmp.ge.s32.totalorder %s584_s17, 1  ;;  %s584_s17 = sphi %s616_s17, %s15_s17   ;;  %s580_s16 = sphi %s614_s16, %s691_s16   ;;  %s576_s15 = sphi %s612_s15, %s690_s15  }
   0x3   : > { %p29_p1 = scmp.ge.s32.totalorder %s27_s18, 4  ;;  %p187_p2 = scmp.lt.s32.totalorder %s584_s17, 5 }
   0x5   : > { %s693_s18 = smov (%p29_p1, %s27_s18), 0  ;;  %p188_p3 = pnand %p502_p0, %p187_p2 }
   0x6   : > { %p225_p4 = scmp.lt.s32.totalorder (!%p188_p3), %s576_s15, 3  ;;  %p528_p5 = scmp.ne.s32.totalorder (!%p188_p3), %s576_s15, 0 }
   0x7   : > { %191 = sbr.rel (%p188_p3) target bundleno = 301 (0x12d), region = 28 }
   0xc   : > { %s634_s19 = scalar_select %p225_p4, %s576_s15, 3  ;;  %vm275_vm0 = vcmask 130048   ;;  %vm338_vm1 = vcmask 1041408   ;;  %vm342_vm2 = vcmask 1045508   ;;  %vm346_vm3 = vcmask 1043456  }
   0xe   : > { %s531_s20 = sshll.u32 %s634_s19, 5  ;;  %s503_s21 = sshll.u32 %s634_s19, 1 }
   0xf   : > { %s237_s24 = scalar_lea.vmem %s686_s1, %s531_s20  ;;  %s228_s27 = scalar_lea.vmem %s685_s0, %s503_s21 }
  0x10   : > { %v510_v0 = vld [vmem:[%s237_s24] sm:$0xf]  ;;  %v535_v1 = vld [vmem:[%s237_s24 + $0xc] sm:$0xf0]  ;;  %v533_v2 = vld [vmem:[%s237_s24 + $0x4] sm:$0xf] }
  0x11   : > { %v511_v3 = vor.u32 %v535_v1, %v510_v0  ;;  %v512_v4 = vld [vmem:[%s237_s24 + $0x10] sm:$0xf0]  ;;  %v518_v5 = vld [vmem:[%s237_s24 + $0x8] sm:$0xf]  ;;  %v536_v6 = vld [vmem:[%s237_s24 + $0x14] sm:$0xf0] }
  0x12   : > { %v515_v7 = vor.u32 %v533_v2, %v512_v4  ;;  %v519_v8 = vor.u32 %v536_v6, %v518_v5  ;;  %v534_v9 = vld [vmem:[%s237_s24 + $0xc] sm:$0xf]  ;;  %v520_v10 = vld [vmem:[%s237_s24 + $0x18] sm:$0xf0]  ;;  %v250_v12 = vld [vmem:[%s228_s27] sm:$0x3] }
  0x13   : > { %286 = vmatpush.bf16.msra.mxu0 %v511_v3  ;;  %v523_v11 = vor.u32 %v534_v9, %v520_v10  ;;  %s532_s28 = sshll.u32 %s634_s19, 3 }
  0x14   : > { %299 = vmatpush.bf16.msra.mxu1 %v515_v7  ;;  %312 = vmatpush.bf16.msra.mxu2 %v519_v8  ;;  %s247_s5 = scalar_lea.vmem %s687_s2, %s532_s28 }
  0x15   : > { %325 = vmatpush.bf16.msra.mxu3 %v523_v11 }
  0x16   : > { %524 = vmatmul.msk.bf16.vlgmr.msra.gmra.mxu0 %vm275_vm0, %v250_v12 }
  0x17   : > { %525 = vmatmul.msk.bf16.vlgmr.msra.gmra.mxu1 %vm275_vm0, %v250_v12  ;;  %526 = vmatmul.msk.bf16.vlgmr.msra.gmra.mxu2 %vm275_vm0, %v250_v12 }
  0x18   : > { %527 = vmatmul.msk.bf16.vlgmr.msra.gmra.mxu3 %vm275_vm0, %v250_v12 }
  0x93   : > { %v288_v13 = vpop.f32.mrf.mxu0 }
  0x94   : > { %v301_v14 = vpop.f32.mrf.mxu1 }
  0x95   : > { %v331_v15 = vpack.c.bf16 %v301_v14, %v288_v13 }
  0x97   : > { %v335_v19 = vrot.slane %v331_v15, 2 }
  0x99   : > { %v341_v24 = vsel %vm338_vm1, %v331_v15, %v335_v19 }
  0x9a   : > { %v314_v16 = vpop.f32.mrf.mxu2 }
  0x9b   : > { %v327_v17 = vpop.f32.mrf.mxu3  ;;  %v290_v18 = vpop.f32.mrf.mxu0 }
  0x9c   : > { %v332_v20 = vpack.c.bf16 %v327_v17, %v314_v16  ;;  %v303_v21 = vpop.f32.mrf.mxu1 }
  0x9e   : > { %v336_v22 = vrot.slane %v332_v20, 4  ;;  %v337_v23 = vrot.slane %v332_v20, 6 }
  0x9f   : > { %354 = sbr.rel (%p528_p5) target bundleno = 167 (0xa7), region = 32 }
  0xa0   : > { %v345_v25 = vsel %vm342_vm2, %v336_v22, %v337_v23 }
  0xa1   : > { %v347_v26 = vsel %vm346_vm3, %v341_v24, %v345_v25 }
  0xa2   : > { %349 = vst [vmem:[%s247_s5] sm:$0xff] %v347_v26  ;;  %v316_v27 = vpop.f32.mrf.mxu2 }
  0xa3   : > { %v329_v28 = vpop.f32.mrf.mxu3 }
  0xa4   : > { %vm355_vm4 = vcmask 3072   ;;  %v586_v29 = vmov 0.0  }
  0xa5   : > { %356 = vst.msk [vmem:[%s688_s3] sm:$0xf] %vm355_vm4, %v586_v29 }
  0xa6   : > { %357 = vst.msk [vmem:[%s689_s4] sm:$0xf] %vm355_vm4, %v586_v29 }
  0xa7 PF: > { %v359_v30 = vsel %vm346_vm3, %v288_v13, 0.0  ;;  %v360_v31 = vsel %vm346_vm3, %v301_v14, 0.0  ;;  %v362_v32 = vsel %vm346_vm3, %v314_v16, 0.0  ;;  %v372_v34 = vmul.f32 %v288_v13, %v288_v13 }
  0xa8   : > { %v361_v33 = vadd.f32 %v360_v31, %v359_v30  ;;  %v373_v35 = vmul.f32 %v301_v14, %v301_v14  ;;  %v374_v36 = vmul.f32 %v314_v16, %v314_v16  ;;  %v364_v37 = vsel %vm346_vm3, %v327_v17, 0.0 }
  0xa9   : > { %v376_v39 = vsel %vm346_vm3, %v372_v34, 0.0  ;;  %v375_v41 = vmul.f32 %v327_v17, %v327_v17  ;;  %vm369_vm5 = vcmask 3072  }
  0xaa   : > { %v363_v38 = vadd.f32 %v362_v32, %v361_v33  ;;  %v377_v40 = vsel %vm346_vm3, %v373_v35, 0.0  ;;  %v379_v43 = vsel %vm346_vm3, %v374_v36, 0.0 }
  0xab   : > { %v378_v42 = vadd.f32 %v377_v40, %v376_v39  ;;  %v381_v46 = vsel %vm346_vm3, %v375_v41, 0.0 }
  0xac   : > { %v365_v44 = vadd.f32 %v364_v37, %v363_v38  ;;  %v358_v48 = vld [vmem:[%s688_s3] sm:$0xf] }
  0xad   : > { %v380_v45 = vadd.f32 %v379_v43, %v378_v42  ;;  %v371_v51 = vld [vmem:[%s689_s4] sm:$0xf] }
  0xae   : > { %366 = vadd.xlane.f32.xlu0 %v365_v44 }
  0xaf   : > { %v382_v47 = vadd.f32 %v381_v46, %v380_v45 }
  0xb6   : > { %383 = vadd.xlane.f32.xlu0 %v382_v47 }
 0x121   : > { %v367_v49 = vpop.xlane.xlu0 %366 }
 0x122   : > { %v368_v50 = vadd.f32 %v367_v49, %v358_v48 }
 0x124   : > { %370 = vst.msk [vmem:[%s688_s3] sm:$0xf] %vm369_vm5, %v368_v50 }
 0x129   : > { %v384_v52 = vpop.xlane.xlu0 %383 }
 0x12a   : > { %v385_v53 = vadd.f32 %v384_v52, %v371_v51 }
 0x12c   : > { %386 = vst.msk [vmem:[%s689_s4] sm:$0xf] %vm369_vm5, %v385_v53 }
 0x12d PF: > { %s15_s17 = sadd.s32 1, %s584_s17   ;;  %s690_s15 = smov %s580_s16 }
 0x12e   : > { %p12_p6 = scmp.ge.s32.totalorder %s15_s17, 6   ;;  %s691_s16 = smov %s693_s18 }
 0x130   :  { %14 = sbr.rel (!%p12_p6) target bundleno = 2 (0x2), region = 81 }

</bundles_post_ra>
